<compile_context>
chip_gen: v5e
topology: v5e:2x2
jax: 0.10.0
libtpu: 0.0.40
codegen_flags: <defaults>
</compile_context>

<pallas_src>
import jax
import jax.numpy as jnp
from jax.experimental import pallas as pl
from jax.experimental.pallas import tpu as pltpu


_LANE = 128      # lane width (last dim)
_SUBLANE = 8     # f32 sublane width (second-to-last dim)


def _round_up(n, m):
    return ((n + m - 1) // m) * m


def _pad2d(a, rows, cols):
    r, c = a.shape
    if r == rows and c == cols:
        return a
    return jnp.pad(a, ((0, rows - r), (0, cols - c)))


def mlp_kernel(x_ref, w1_ref, b1_ref, w2_ref, b2_ref, out_ref):
    # Layer 1: (TB, I) @ (I, H) on the MXU, f32 accumulation.
    h = jnp.dot(x_ref[...], w1_ref[...], preferred_element_type=jnp.float32)
    h = h + b1_ref[...].astype(jnp.float32)          # (1, H) broadcast over (TB, H)
    h = jnp.maximum(h, 0.0)                          # ReLU (VPU)
    # Layer 2: (TB, H) @ (H, O) on the MXU, f32 accumulation.
    o = jnp.dot(h.astype(w2_ref.dtype), w2_ref[...],
                preferred_element_type=jnp.float32)
    o = o + b2_ref[...].astype(jnp.float32)
    out_ref[...] = o.astype(out_ref.dtype)


def mlp_forward(x, w1_t, b1, w2_t, b2, *, block_b=128, compute_dtype=None):
    """x: [..., I]; w1_t: [I, H]; b1: [H]; w2_t: [H, O]; b2: [O] -> [..., O].

    Weights are pre-transposed relative to nn.Linear (which stores [out, in]).
    compute_dtype: optional matmul-input dtype (e.g. jnp.bfloat16); accumulation
    and bias/ReLU stay f32.
    """
    lead_shape = x.shape[:-1]
    I = x.shape[-1]
    H = w1_t.shape[1]
    O = w2_t.shape[1]
    out_dtype = x.dtype

    x2d = x.reshape(-1, I)
    B = x2d.shape[0]

    if compute_dtype is not None:
        x2d = x2d.astype(compute_dtype)
        w1_t = w1_t.astype(compute_dtype)
        w2_t = w2_t.astype(compute_dtype)

    # Lane-dense padding of every feature axis (zero padding is exact here:
    # padded inputs/weights contribute 0, padded bias is 0, ReLU(0)=0).
    Ip = _round_up(I, _LANE)
    Hp = _round_up(H, _LANE)
    Op = _round_up(O, _LANE)

    # Batch tile: at least 8 sublanes, at most block_b rows per grid step.
    TB = min(_round_up(block_b, _SUBLANE), _round_up(B, _SUBLANE))
    Bp = _round_up(B, TB)

    xp = _pad2d(x2d, Bp, Ip)
    w1p = _pad2d(w1_t, Ip, Hp)
    b1p = _pad2d(b1.reshape(1, -1), 1, Hp)
    w2p = _pad2d(w2_t, Hp, Op)
    b2p = _pad2d(b2.reshape(1, -1), 1, Op)

    grid = (Bp // TB,)

    in_itemsize = jnp.dtype(xp.dtype).itemsize
    out_itemsize = jnp.dtype(out_dtype).itemsize
    flops = 2 * Bp * Ip * Hp + 2 * Bp * Hp * Op
    bytes_accessed = (
        (xp.size + w1p.size + b1p.size + w2p.size + b2p.size) * in_itemsize
        + Bp * Op * out_itemsize
    )

    # Only raise the scoped-VMEM limit when actually needed (keeps the default
    # pipelining behavior for small shapes; cap well under v7x's 64 MiB).
    resident_bytes = (w1p.size + b1p.size + w2p.size + b2p.size) * in_itemsize
    tile_bytes = 2 * (TB * Ip * in_itemsize + TB * Op * out_itemsize)  # dbl-buffered
    need_bytes = int(1.5 * (resident_bytes + tile_bytes)) + (4 << 20)
    vmem_limit = None
    if need_bytes > (32 << 20):
        vmem_limit = min(need_bytes, 60 << 20)

    out_p = pl.pallas_call(
        mlp_kernel,
        out_shape=jax.ShapeDtypeStruct((Bp, Op), out_dtype),
        grid_spec=pl.GridSpec(
            grid=grid,
            in_specs=[
                # Activations stream along the batch grid axis (pipelined).
                pl.BlockSpec((TB, Ip), lambda i: (i, 0)),
                # Weights / biases: constant index_map -> resident in VMEM.
                pl.BlockSpec((Ip, Hp), lambda i: (0, 0)),
                pl.BlockSpec((1, Hp), lambda i: (0, 0)),
                pl.BlockSpec((Hp, Op), lambda i: (0, 0)),
                pl.BlockSpec((1, Op), lambda i: (0, 0)),
            ],
            out_specs=pl.BlockSpec((TB, Op), lambda i: (i, 0)),
        ),
        compiler_params=pltpu.CompilerParams(
            dimension_semantics=("parallel",),
            vmem_limit_bytes=vmem_limit),
        cost_estimate=pl.CostEstimate(
            flops=flops, transcendentals=0, bytes_accessed=bytes_accessed),
    )(xp, w1p, b1p, w2p, b2p)

    return out_p[:B, :O].reshape(*lead_shape, O)


def _ref_mlp(x, w1_t, b1, w2_t, b2):
    return jnp.maximum(x @ w1_t + b1.reshape(1, -1), 0.0) @ w2_t + b2.reshape(1, -1)


def _make_params(key, input_size, hidden_size, output_size):
    kw1, kb1, kw2, kb2 = jax.random.split(key, 4)
    bound1 = 1.0 / (input_size ** 0.5)
    w1_t = jax.random.uniform(kw1, (input_size, hidden_size),
                              minval=-bound1, maxval=bound1, dtype=jnp.float32)
    b1 = jax.random.uniform(kb1, (hidden_size,),
                            minval=-bound1, maxval=bound1, dtype=jnp.float32)
    bound2 = 1.0 / (hidden_size ** 0.5)
    w2_t = jax.random.uniform(kw2, (hidden_size, output_size),
                              minval=-bound2, maxval=bound2, dtype=jnp.float32)
    b2 = jax.random.uniform(kb2, (output_size,),
                            minval=-bound2, maxval=bound2, dtype=jnp.float32)
    return w1_t, b1, w2_t, b2


if __name__ == "__main__":
    key = jax.random.PRNGKey(0)
    k1, k2, k3, k4 = jax.random.split(key, 4)

    # Case 1: small shapes implied by the module (single grid step, padded lanes).
    batch, input_size, hidden_size, output_size = 8, 32, 64, 16
    x = jax.random.normal(k1, (batch, input_size), dtype=jnp.float32)
    w1_t, b1, w2_t, b2 = _make_params(k2, input_size, hidden_size, output_size)

    out = mlp_forward(x, w1_t, b1, w2_t, b2)
    jax.block_until_ready(out)
    ref = _ref_mlp(x, w1_t, b1, w2_t, b2)
    assert out.shape == (batch, output_size)
    assert jnp.allclose(out, ref, atol=1e-5, rtol=1e-5)

    # Case 2: batch tiling (grid > 1), padding on all dims, leading-dim reshape.
    batch2, seq2, in2, hid2, out2 = 6, 50, 96, 160, 40
    x2 = jax.random.normal(k3, (batch2, seq2, in2), dtype=jnp.float32)
    w1b, b1b, w2b, b2b = _make_params(k4, in2, hid2, out2)

    y2 = mlp_forward(x2, w1b, b1b, w2b, b2b, block_b=128)
    jax.block_until_ready(y2)
    ref2 = _ref_mlp(x2.reshape(-1, in2), w1b, b1b, w2b, b2b).reshape(batch2, seq2, out2)
    assert y2.shape == (batch2, seq2, out2)
    assert jnp.allclose(y2, ref2, atol=1e-5, rtol=1e-5)

    # Case 3: bf16 matmul inputs with f32 accumulation (perf path); loose tol.
    y3 = mlp_forward(x2, w1b, b1b, w2b, b2b, compute_dtype=jnp.bfloat16)
    jax.block_until_ready(y3)
    assert jnp.allclose(y3, ref2, atol=5e-2, rtol=5e-2)

    print("KERNEL_OK")
</pallas_src>

<mosaic_0001>
module attributes {stable_mosaic.version = 11 : i64} {
  func.func @mlp_kernel(%arg0: i32, %arg1: memref<8x128xf32, #tpu.memory_space<vmem>>, %arg2: memref<128x128xf32, #tpu.memory_space<vmem>>, %arg3: memref<1x128xf32, #tpu.memory_space<vmem>>, %arg4: memref<128x128xf32, #tpu.memory_space<vmem>>, %arg5: memref<1x128xf32, #tpu.memory_space<vmem>>, %arg6: memref<8x128xf32, #tpu.memory_space<vmem>>) attributes {dimension_semantics = [#tpu.dimension_semantics<parallel>], iteration_bounds = array<i64: 1>, scalar_prefetch = 0 : i64, scratch_operands = 0 : i64, tpu.core_type = #tpu.core_type<tc>, window_params = [{transform_indices = @transform_0, window_bounds = array<i64: 8, 128>}, {pipeline_mode = #tpu.pipeline_mode<synchronous>, transform_indices = @transform_1, window_bounds = array<i64: 128, 128>}, {pipeline_mode = #tpu.pipeline_mode<synchronous>, transform_indices = @transform_2, window_bounds = array<i64: 1, 128>}, {pipeline_mode = #tpu.pipeline_mode<synchronous>, transform_indices = @transform_3, window_bounds = array<i64: 128, 128>}, {pipeline_mode = #tpu.pipeline_mode<synchronous>, transform_indices = @transform_4, window_bounds = array<i64: 1, 128>}, {transform_indices = @transform_5, window_bounds = array<i64: 8, 128>}]} {
    %c0 = arith.constant 0 : index
    %c0_0 = arith.constant 0 : index
    %0 = vector.load %arg1[%c0, %c0_0] : memref<8x128xf32, #tpu.memory_space<vmem>>, vector<8x128xf32>
    %c0_1 = arith.constant 0 : index
    %c0_2 = arith.constant 0 : index
    %1 = vector.load %arg2[%c0_1, %c0_2] : memref<128x128xf32, #tpu.memory_space<vmem>>, vector<128x128xf32>
    %cst = arith.constant dense<0.000000e+00> : vector<8x128xf32>
    %2 = tpu.matmul %0, %1, %cst {dimension_numbers = #tpu.dot_dimension_numbers<[1], [0], [0], [1], [0, 0, 1, 1], [], []>} : vector<8x128xf32>, vector<128x128xf32>, vector<8x128xf32> -> vector<8x128xf32>
    %c0_3 = arith.constant 0 : index
    %c0_4 = arith.constant 0 : index
    %3 = vector.load %arg3[%c0_3, %c0_4] : memref<1x128xf32, #tpu.memory_space<vmem>>, vector<1x128xf32>
    %4 = vector.broadcast %3 : vector<1x128xf32> to vector<8x128xf32>
    %5 = arith.addf %2, %4 : vector<8x128xf32>
    %cst_5 = arith.constant 0.000000e+00 : f32
    %6 = vector.broadcast %cst_5 : f32 to vector<8x128xf32>
    %7 = arith.maximumf %5, %6 : vector<8x128xf32>
    %c0_6 = arith.constant 0 : index
    %c0_7 = arith.constant 0 : index
    %8 = vector.load %arg4[%c0_6, %c0_7] : memref<128x128xf32, #tpu.memory_space<vmem>>, vector<128x128xf32>
    %cst_8 = arith.constant dense<0.000000e+00> : vector<8x128xf32>
    %9 = tpu.matmul %7, %8, %cst_8 {dimension_numbers = #tpu.dot_dimension_numbers<[1], [0], [0], [1], [0, 0, 1, 1], [], []>} : vector<8x128xf32>, vector<128x128xf32>, vector<8x128xf32> -> vector<8x128xf32>
    %c0_9 = arith.constant 0 : index
    %c0_10 = arith.constant 0 : index
    %10 = vector.load %arg5[%c0_9, %c0_10] : memref<1x128xf32, #tpu.memory_space<vmem>>, vector<1x128xf32>
    %11 = vector.broadcast %10 : vector<1x128xf32> to vector<8x128xf32>
    %12 = arith.addf %9, %11 : vector<8x128xf32>
    %c0_11 = arith.constant 0 : index
    %c0_12 = arith.constant 0 : index
    %13 = vector.load %arg6[%c0_11, %c0_12] : memref<8x128xf32, #tpu.memory_space<vmem>>, vector<8x128xf32>
    tpu.vector_store %arg6[%c0_11, %c0_12], %12 {strides = array<i32>} : memref<8x128xf32, #tpu.memory_space<vmem>>, vector<8x128xf32>,
    return
  }
  func.func @transform_0(%arg0: i32) -> (i32, i32) {
    %c0_i32 = arith.constant 0 : i32
    %c0_i32_0 = arith.constant 0 : i32
    return %arg0, %c0_i32 : i32, i32
  }
  func.func @transform_1(%arg0: i32) -> (i32, i32) {
    %c0_i32 = arith.constant 0 : i32
    %c0_i32_0 = arith.constant 0 : i32
    %c0_i32_1 = arith.constant 0 : i32
    return %c0_i32, %c0_i32_0 : i32, i32
  }
  func.func @transform_2(%arg0: i32) -> (i32, i32) {
    %c0_i32 = arith.constant 0 : i32
    %c0_i32_0 = arith.constant 0 : i32
    %c0_i32_1 = arith.constant 0 : i32
    return %c0_i32, %c0_i32_0 : i32, i32
  }
  func.func @transform_3(%arg0: i32) -> (i32, i32) {
    %c0_i32 = arith.constant 0 : i32
    %c0_i32_0 = arith.constant 0 : i32
    %c0_i32_1 = arith.constant 0 : i32
    return %c0_i32, %c0_i32_0 : i32, i32
  }
  func.func @transform_4(%arg0: i32) -> (i32, i32) {
    %c0_i32 = arith.constant 0 : i32
    %c0_i32_0 = arith.constant 0 : i32
    %c0_i32_1 = arith.constant 0 : i32
    return %c0_i32, %c0_i32_0 : i32, i32
  }
  func.func @transform_5(%arg0: i32) -> (i32, i32) {
    %c0_i32 = arith.constant 0 : i32
    %c0_i32_0 = arith.constant 0 : i32
    return %arg0, %c0_i32 : i32, i32
  }
}

</mosaic_0001>

<bundles_post_ra>
// kernel: tpu_custom_call.1
= control target key start
LH: loop header
LB: loop body
LE: loop exit
PB: predicated region body
PF: predicated region fallthrough
CT: control target
= control target key end

     0   :  { %10 = vsyncpa [#allocation3], 0  ;;  %s331_s0 = inlined_call_operand.hbm [shape: f32[8,128], index: 0, kind: input, shape index: {}]   ;;  %s332_s1 = inlined_call_operand.hbm [shape: f32[128,128], index: 1, kind: input, shape index: {}]   ;;  %s333_s2 = inlined_call_operand.vmem [shape: f32[1,128], index: 2, kind: input, shape index: {}]   ;;  %s334_s3 = inlined_call_operand.hbm [shape: f32[128,128], index: 3, kind: input, shape index: {}]   ;;  %s335_s4 = inlined_call_operand.vmem [shape: f32[1,128], index: 4, kind: input, shape index: {}]   ;;  %s336_s5 = inlined_call_operand.hbm [shape: f32[8,128], index: 5, kind: output, shape index: {}]  }
   0x1   :  { %11 = vsyncpa [#allocation6], 0  ;;  %s28_s20 = sshll.u32 %s332_s1, 4  ;;  %s29_s20 = int_to_ptr.hbm [resolvable:$true] %s28_s20 }
   0x2   :  { %12 = vsyncpa [#allocation4], 0  ;;  %s277_s21 = smov [#allocation5]   ;;  %s18_s25 = sshll.u32 %s331_s0, 4  ;;  %s19_s25 = int_to_ptr.hbm [resolvable:$true] %s18_s25 }
   0x3   :  { %s30_s22 = sshll.u32 %s277_s21, 4  ;;  %s278_s26 = smov 128   ;;  %s31_s22 = int_to_ptr.vmem [resolvable:$true] %s30_s22 }
   0x4   :  { %s279_s27 = smov 8   ;;  %s280_s28 = smov [#allocation2]  }
   0x5   :  { %36 = dma.hbm_to_vmem [thread:$0]  %s29_s20, 2048, %s31_s22, [#allocation6], %s278_s26, %s278_s26, %s279_s27  }
   0x6   :  { %s20_s29 = sshll.u32 %s280_s28, 4  ;;  %s43_s7 = sshll.u32 %s334_s3, 4  ;;  %s21_s29 = int_to_ptr.vmem [resolvable:$true] %s20_s29  ;;  %s44_s7 = int_to_ptr.hbm [resolvable:$true] %s43_s7 }
   0x7   :  { %23 = dma.hbm_to_vmem [thread:$0]  %s19_s25, 128, %s21_s29, [#allocation3]  }
   0x8   :  { %s281_s1 = smov [#allocation7]  }
   0x9   :  { %s45_s8 = sshll.u32 %s281_s1, 4  ;;  %s46_s8 = int_to_ptr.vmem [resolvable:$true] %s45_s8 }
   0xa   :  { %51 = dma.hbm_to_vmem [thread:$0]  %s44_s7, 2048, %s46_s8, [#allocation6], %s278_s26, %s278_s26, %s279_s27  }
   0xb   :  { %271 = dma.done.wait [#allocation3], 128  }
   0xc   :  { %272 = vsyncadd [#allocation3], 4294967168 }
   0xd   :  { %273 = dma.done.wait [#allocation6], 4096  }
   0xe   :  { %274 = vsyncadd [#allocation6], 4294963200  ;;  %v82_v0 = vld [vmem:[#allocation5 + $0x78] sm:$0xff]  ;;  %v81_v1 = vld [vmem:[#allocation5 + $0x70] sm:$0xff]  ;;  %s282_s11 = smov [#allocation8]   ;;  %s156_s15 = sshll.u32 %s336_s5, 4  ;;  %s157_s15 = int_to_ptr.hbm [resolvable:$true] %s156_s15 }
   0xf   :  { %87 = vmatpush.msra.mxu0 %v82_v0  ;;  %v80_v2 = vld [vmem:[#allocation5 + $0x68] sm:$0xff]  ;;  %v79_v3 = vld [vmem:[#allocation5 + $0x60] sm:$0xff]  ;;  %v123_v4 = vld [vmem:[#allocation7 + $0x78] sm:$0xff]  ;;  %s154_s12 = sshll.u32 %s282_s11, 4  ;;  %s155_s12 = int_to_ptr.vmem [resolvable:$true] %s154_s12 }
  0x10   :  { %v78_v5 = vld [vmem:[#allocation5 + $0x58] sm:$0xff]  ;;  %128 = vmatpush.msra.mxu1 %v123_v4  ;;  %v122_v6 = vld [vmem:[#allocation7 + $0x70] sm:$0xff]  ;;  %v121_v7 = vld [vmem:[#allocation7 + $0x68] sm:$0xff] }
  0x11   :  { %88 = vmatpush.msra.mxu0 %v81_v1  ;;  %v77_v8 = vld [vmem:[#allocation5 + $0x50] sm:$0xff]  ;;  %v120_v9 = vld [vmem:[#allocation7 + $0x60] sm:$0xff]  ;;  %v76_v10 = vld [vmem:[#allocation5 + $0x48] sm:$0xff] }
  0x12   :  { %129 = vmatpush.msra.mxu1 %v122_v6  ;;  %v119_v11 = vld [vmem:[#allocation7 + $0x58] sm:$0xff]  ;;  %v75_v12 = vld [vmem:[#allocation5 + $0x40] sm:$0xff]  ;;  %v118_v13 = vld [vmem:[#allocation7 + $0x50] sm:$0xff] }
  0x13   :  { %89 = vmatpush.msra.mxu0 %v80_v2  ;;  %v74_v14 = vld [vmem:[#allocation5 + $0x38] sm:$0xff]  ;;  %v117_v15 = vld [vmem:[#allocation7 + $0x48] sm:$0xff]  ;;  %v73_v16 = vld [vmem:[#allocation5 + $0x30] sm:$0xff] }
  0x14   :  { %130 = vmatpush.msra.mxu1 %v121_v7  ;;  %v116_v17 = vld [vmem:[#allocation7 + $0x40] sm:$0xff]  ;;  %v72_v18 = vld [vmem:[#allocation5 + $0x28] sm:$0xff]  ;;  %v115_v19 = vld [vmem:[#allocation7 + $0x38] sm:$0xff] }
  0x15   :  { %90 = vmatpush.msra.mxu0 %v79_v3  ;;  %v71_v20 = vld [vmem:[#allocation5 + $0x20] sm:$0xff]  ;;  %v114_v21 = vld [vmem:[#allocation7 + $0x30] sm:$0xff]  ;;  %v70_v22 = vld [vmem:[#allocation5 + $0x18] sm:$0xff] }
  0x16   :  { %131 = vmatpush.msra.mxu1 %v120_v9  ;;  %v113_v23 = vld [vmem:[#allocation7 + $0x28] sm:$0xff]  ;;  %v69_v24 = vld [vmem:[#allocation5 + $0x10] sm:$0xff]  ;;  %v112_v25 = vld [vmem:[#allocation7 + $0x20] sm:$0xff] }
  0x17   :  { %91 = vmatpush.msra.mxu0 %v78_v5  ;;  %v68_v26 = vld [vmem:[#allocation5 + $0x8] sm:$0xff]  ;;  %v111_v27 = vld [vmem:[#allocation7 + $0x18] sm:$0xff]  ;;  %v67_v28 = vld [vmem:[#allocation5] sm:$0xff] }
  0x18   :  { %132 = vmatpush.msra.mxu1 %v119_v11  ;;  %v66_v29 = vld [vmem:[#allocation2] sm:$0xff]  ;;  %v110_v30 = vld [vmem:[#allocation7 + $0x10] sm:$0xff]  ;;  %v109_v31 = vld [vmem:[#allocation7 + $0x8] sm:$0xff] }
  0x19   :  { %92 = vmatpush.msra.mxu0 %v77_v8  ;;  %v108_v32 = vld [vmem:[#allocation7] sm:$0xff]  ;;  %v173_v33 = vld [vmem:[%s333_s2] ss:$0 sm:$0xff] }
  0x1a   :  { %133 = vmatpush.msra.mxu1 %v118_v13  ;;  %v174_v37 = vld [vmem:[%s335_s4] ss:$0 sm:$0xff] }
  0x1b   :  { %93 = vmatpush.msra.mxu0 %v76_v10 }
  0x1c   :  { %134 = vmatpush.msra.mxu1 %v117_v15 }
  0x1d   :  { %94 = vmatpush.msra.mxu0 %v75_v12 }
  0x1e   :  { %135 = vmatpush.msra.mxu1 %v116_v17 }
  0x1f   :  { %95 = vmatpush.msra.mxu0 %v74_v14 }
  0x20   :  { %136 = vmatpush.msra.mxu1 %v115_v19 }
  0x21   :  { %96 = vmatpush.msra.mxu0 %v73_v16 }
  0x22   :  { %137 = vmatpush.msra.mxu1 %v114_v21 }
  0x23   :  { %97 = vmatpush.msra.mxu0 %v72_v18 }
  0x24   :  { %138 = vmatpush.msra.mxu1 %v113_v23 }
  0x25   :  { %98 = vmatpush.msra.mxu0 %v71_v20 }
  0x26   :  { %139 = vmatpush.msra.mxu1 %v112_v25 }
  0x27   :  { %99 = vmatpush.msra.mxu0 %v70_v22 }
  0x28   :  { %140 = vmatpush.msra.mxu1 %v111_v27 }
  0x29   :  { %100 = vmatpush.msra.mxu0 %v69_v24 }
  0x2a   :  { %141 = vmatpush.msra.mxu1 %v110_v30 }
  0x2b   :  { %101 = vmatpush.msra.mxu0 %v68_v26 }
  0x2c   :  { %142 = vmatpush.msra.mxu1 %v109_v31 }
  0x2d   :  { %102 = vmatpush.msra.mxu0 %v67_v28 }
  0x2e   :  { %103 = vmatmul.f32.vlgmr.msra.gmra.mxu0 %v66_v29  ;;  %143 = vmatpush.msra.mxu1 %v108_v32 }
  0xab   :  { %v104_v34 = vpop.f32.mrf.mxu0 }
  0xac   :  { %v105_v35 = vadd.f32 %v173_v33, %v104_v34 }
  0xae   :  { %v107_v36 = vmax.f32 %v105_v35, 0.0 }
  0xb0   :  { %144 = vmatmul.f32.vlgmr.msra.gmra.mxu1 %v107_v36 }
 0x12d   :  { %v145_v38 = vpop.f32.mrf.mxu1 }
 0x12e   :  { %v146_v39 = vadd.f32 %v174_v37, %v145_v38 }
 0x130   :  { %148 = vst [vmem:[#allocation8] sm:$0xff] %v146_v39 }
 0x131   :  { %159 = dma.vmem_to_hbm [thread:$0]  %s155_s12, 128, %s157_s15, [#allocation4]  }
 0x132   :  { %275 = dma.done.wait [#allocation4], 128  }
 0x133   :  { %276 = vsyncadd [#allocation4], 4294967168 }
 0x134   :  { %164 = vsyncpa [#allocation3], 1 }
 0x135   :  { %165 = vsyncpa [#allocation6], 1 }
 0x136   :  { %166 = vsyncpa [#allocation4], 1 }

</bundles_post_ra>
